<compile_context>
chip_gen: v6e
topology: v6e:2x2x1
jax: 0.10.0
libtpu: 0.0.40
codegen_flags: <defaults>
</compile_context>

<pallas_src>
import jax
import jax.numpy as jnp
from jax import lax
from jax.experimental import pallas as pl
from jax.experimental.pallas import tpu as pltpu


def _round_up(x: int, m: int) -> int:
    return ((x + m - 1) // m) * m


def _linear_kernel(x_ref, w_ref, b_ref, o_ref):
    # x_ref: (TM, D_in)        VMEM tile of the batch
    # w_ref: (N_pad, D_in)     full weight, PyTorch layout, grid-invariant
    # b_ref: (1, N_pad)        bias row, grid-invariant
    # o_ref: (TM, N_pad)       lane-dense output tile (N_pad % 128 == 0)
    acc = lax.dot_general(
        x_ref[...],
        w_ref[...],
        dimension_numbers=(((1,), (1,)), ((), ())),  # contract D_in with D_in
        preferred_element_type=jnp.float32,
    )
    o_ref[...] = (acc + b_ref[...]).astype(o_ref.dtype)


def logistic_regression_forward(x, weight, bias, *, block_m: int = 256):
    """y = x @ weight.T + bias  (same semantics as torch.nn.Linear).

    x:      (batch, input_dim)        float32
    weight: (output_dim, input_dim)   float32  (PyTorch nn.Linear convention)
    bias:   (output_dim,)             float32
    returns (batch, output_dim)       float32
    """
    batch, input_dim = x.shape
    output_dim = weight.shape[0]

    # --- pad to TPU-friendly shapes ----------------------------------------
    # Output dim -> multiple of 128 so the output store is lane-dense.
    n_pad = _round_up(output_dim, 128)
    # Batch tile: at most `block_m` rows, 8-aligned (sublane constraint).
    tm = min(block_m, _round_up(batch, 8))
    m_pad = _round_up(batch, tm)

    x_p = x if m_pad == batch else jnp.pad(x, ((0, m_pad - batch), (0, 0)))
    w_p = (
        weight
        if n_pad == output_dim
        else jnp.pad(weight, ((0, n_pad - output_dim), (0, 0)))
    )
    b_p = jnp.pad(bias, (0, n_pad - output_dim)).reshape(1, n_pad)

    grid = (m_pad // tm,)

    out = pl.pallas_call(
        _linear_kernel,
        out_shape=jax.ShapeDtypeStruct((m_pad, n_pad), x.dtype),
        grid_spec=pltpu.PrefetchScalarGridSpec(
            num_scalar_prefetch=0,
            grid=grid,
            in_specs=[
                # x: tiled over the batch (double-buffered by the pipeline).
                pl.BlockSpec((tm, input_dim), lambda i: (i, 0)),
                # weight: grid-invariant, stays resident in VMEM.
                pl.BlockSpec((n_pad, input_dim), lambda i: (0, 0)),
                # bias: grid-invariant.
                pl.BlockSpec((1, n_pad), lambda i: (0, 0)),
            ],
            out_specs=pl.BlockSpec((tm, n_pad), lambda i: (i, 0)),
        ),
        compiler_params=pltpu.CompilerParams(
            # Batch rows are independent -> megacore/TC sharding on v7x.
            dimension_semantics=("parallel",),
            # Tiny tiles here; 32 MiB scoped VMEM is safe on v5e/v6e/v7x.
            vmem_limit_bytes=32 * 1024 * 1024,
        ),
    )(x_p, w_p, b_p)

    # Strip the padding added for alignment.
    return out[:batch, :output_dim]

    # TODO(synk): if input_dim ever becomes large, add a trailing "arbitrary"
    # K grid axis with a VMEM f32 accumulator (pl.when init/finalize) instead
    # of keeping the full weight resident.


if __name__ == "__main__":
    # Small shapes consistent with the module: a logistic-regression head.
    batch, input_dim, output_dim = 256, 32, 16

    key = jax.random.PRNGKey(0)
    kx, kw, kb = jax.random.split(key, 3)

    x = jax.random.normal(kx, (batch, input_dim), dtype=jnp.float32)
    # Mimic nn.Linear's uniform(-1/sqrt(fan_in), 1/sqrt(fan_in)) init.
    bound = 1.0 / (input_dim ** 0.5)
    weight = jax.random.uniform(
        kw, (output_dim, input_dim), dtype=jnp.float32, minval=-bound, maxval=bound
    )
    bias = jax.random.uniform(
        kb, (output_dim,), dtype=jnp.float32, minval=-bound, maxval=bound
    )

    y = logistic_regression_forward(x, weight, bias)
    y = jax.block_until_ready(y)

    # Reference check against plain JAX (same semantics as torch nn.Linear).
    y_ref = x @ weight.T + bias
    assert y.shape == (batch, output_dim)
    assert jnp.allclose(y, y_ref, atol=1e-5, rtol=1e-5)

    print("KERNEL_OK")
</pallas_src>

<mosaic_0001>
module attributes {stable_mosaic.version = 11 : i64} {
  func.func @_linear_kernel(%arg0: i32, %arg1: memref<256x32xf32, #tpu.memory_space<vmem>>, %arg2: memref<128x32xf32, #tpu.memory_space<vmem>>, %arg3: memref<1x128xf32, #tpu.memory_space<vmem>>, %arg4: memref<256x128xf32, #tpu.memory_space<vmem>>) attributes {dimension_semantics = [#tpu.dimension_semantics<parallel>], iteration_bounds = array<i64: 1>, scalar_prefetch = 0 : i64, scratch_operands = 0 : i64, tpu.core_type = #tpu.core_type<tc>, window_params = [{transform_indices = @transform_0, window_bounds = array<i64: 256, 32>}, {pipeline_mode = #tpu.pipeline_mode<synchronous>, transform_indices = @transform_1, window_bounds = array<i64: 128, 32>}, {pipeline_mode = #tpu.pipeline_mode<synchronous>, transform_indices = @transform_2, window_bounds = array<i64: 1, 128>}, {transform_indices = @transform_3, window_bounds = array<i64: 256, 128>}]} {
    %c0 = arith.constant 0 : index
    %c0_0 = arith.constant 0 : index
    %0 = vector.load %arg1[%c0, %c0_0] : memref<256x32xf32, #tpu.memory_space<vmem>>, vector<256x32xf32>
    %c0_1 = arith.constant 0 : index
    %c0_2 = arith.constant 0 : index
    %1 = vector.load %arg2[%c0_1, %c0_2] : memref<128x32xf32, #tpu.memory_space<vmem>>, vector<128x32xf32>
    %cst = arith.constant dense<0.000000e+00> : vector<256x128xf32>
    %2 = tpu.matmul %0, %1, %cst {dimension_numbers = #tpu.dot_dimension_numbers<[1], [1], [0], [0], [0, 0, 1, 0], [], []>} : vector<256x32xf32>, vector<128x32xf32>, vector<256x128xf32> -> vector<256x128xf32>
    %c0_3 = arith.constant 0 : index
    %c0_4 = arith.constant 0 : index
    %3 = vector.load %arg3[%c0_3, %c0_4] : memref<1x128xf32, #tpu.memory_space<vmem>>, vector<1x128xf32>
    %4 = vector.broadcast %3 : vector<1x128xf32> to vector<256x128xf32>
    %5 = arith.addf %2, %4 : vector<256x128xf32>
    %c0_5 = arith.constant 0 : index
    %c0_6 = arith.constant 0 : index
    %6 = vector.load %arg4[%c0_5, %c0_6] : memref<256x128xf32, #tpu.memory_space<vmem>>, vector<256x128xf32>
    tpu.vector_store %arg4[%c0_5, %c0_6], %5 {strides = array<i32>} : memref<256x128xf32, #tpu.memory_space<vmem>>, vector<256x128xf32>,
    return
  }
  func.func @transform_0(%arg0: i32) -> (i32, i32) {
    %c0_i32 = arith.constant 0 : i32
    %c0_i32_0 = arith.constant 0 : i32
    return %arg0, %c0_i32 : i32, i32
  }
  func.func @transform_1(%arg0: i32) -> (i32, i32) {
    %c0_i32 = arith.constant 0 : i32
    %c0_i32_0 = arith.constant 0 : i32
    %c0_i32_1 = arith.constant 0 : i32
    return %c0_i32, %c0_i32_0 : i32, i32
  }
  func.func @transform_2(%arg0: i32) -> (i32, i32) {
    %c0_i32 = arith.constant 0 : i32
    %c0_i32_0 = arith.constant 0 : i32
    %c0_i32_1 = arith.constant 0 : i32
    return %c0_i32, %c0_i32_0 : i32, i32
  }
  func.func @transform_3(%arg0: i32) -> (i32, i32) {
    %c0_i32 = arith.constant 0 : i32
    %c0_i32_0 = arith.constant 0 : i32
    return %arg0, %c0_i32 : i32, i32
  }
}

</mosaic_0001>

<bundles_post_ra>
// kernel: tpu_custom_call.1
= control target key start
LH: loop header
LB: loop body
LE: loop exit
PB: predicated region body
PF: predicated region fallthrough
CT: control target
= control target key end

     0   :  { %vm70_vm0 = vcmask 261120   ;;  %s1025_s0 = inlined_call_operand.vmem [shape: f32[256,32], index: 0, kind: input, shape index: {}]   ;;  %s1026_s1 = inlined_call_operand.vmem [shape: f32[128,32], index: 1, kind: input, shape index: {}]   ;;  %s1027_s2 = inlined_call_operand.vmem [shape: f32[1,128], index: 2, kind: input, shape index: {}]   ;;  %s1028_s3 = inlined_call_operand.hbm [shape: f32[256,128], index: 3, kind: output, shape index: {}]  }
   0x1   :  { %v62_v0 = vld [vmem:[%s1026_s1 + $0x78] sm:$0xff]  ;;  %v61_v1 = vld [vmem:[%s1026_s1 + $0x70] sm:$0xff]  ;;  %v60_v2 = vld [vmem:[%s1026_s1 + $0x68] sm:$0xff] }
   0x2   :  { %585 = vmatprep.subr.msk.mxu0 %vm70_vm0, %v62_v0  ;;  %665 = vmatprep.subr.msk.mxu1 %vm70_vm0, %v62_v0  ;;  %v15_v3 = vld [vmem:[%s1025_s0] sm:$0xff]  ;;  %v58_v6 = vld [vmem:[%s1026_s1 + $0x58] sm:$0xff]  ;;  %v57_v7 = vld [vmem:[%s1026_s1 + $0x50] sm:$0xff] }
   0x3   :  { %586 = vmatpush3.xpose.msk.msra.mxu0 %vm70_vm0, %v62_v0  ;;  %681 = vmatpush3.xpose.msk.msra.mxu1 %vm70_vm0, %v62_v0  ;;  %v31_v4 = vld [vmem:[%s1025_s0 + $0x80] sm:$0xff] }
   0x4   :  { %587 = vmatprep.subr.msk.mxu0 %vm70_vm0, %v61_v1  ;;  %666 = vmatprep.subr.msk.mxu1 %vm70_vm0, %v61_v1  ;;  %v59_v5 = vld [vmem:[%s1026_s1 + $0x60] sm:$0xff] }
   0x5   :  { %617 = vmatprep.mubr.msk.f32.mxu0 %vm70_vm0, %v15_v3  ;;  %641 = vmatprep.mubr.msk.f32.mxu1 %vm70_vm0, %v31_v4 }
   0x7   :  { %588 = vmatpush3.xpose.msk.msra.mxu0 %vm70_vm0, %v61_v1  ;;  %682 = vmatpush3.xpose.msk.msra.mxu1 %vm70_vm0, %v61_v1 }
   0x8   :  { %589 = vmatprep.subr.msk.mxu0 %vm70_vm0, %v60_v2  ;;  %667 = vmatprep.subr.msk.mxu1 %vm70_vm0, %v60_v2 }
   0xb   :  { %590 = vmatpush3.xpose.msk.msra.mxu0 %vm70_vm0, %v60_v2  ;;  %683 = vmatpush3.xpose.msk.msra.mxu1 %vm70_vm0, %v60_v2 }
   0xc   :  { %591 = vmatprep.subr.msk.mxu0 %vm70_vm0, %v59_v5  ;;  %668 = vmatprep.subr.msk.mxu1 %vm70_vm0, %v59_v5 }
   0xf   :  { %592 = vmatpush3.xpose.msk.msra.mxu0 %vm70_vm0, %v59_v5  ;;  %684 = vmatpush3.xpose.msk.msra.mxu1 %vm70_vm0, %v59_v5 }
  0x10   :  { %593 = vmatprep.subr.msk.mxu0 %vm70_vm0, %v58_v6  ;;  %669 = vmatprep.subr.msk.mxu1 %vm70_vm0, %v58_v6 }
  0x11   :  { %8 = vsyncpa [#allocation3], 0  ;;  %v56_v8 = vld [vmem:[%s1026_s1 + $0x48] sm:$0xff]  ;;  %v55_v9 = vld [vmem:[%s1026_s1 + $0x40] sm:$0xff] }
  0x12   :  { %v54_v10 = vld [vmem:[%s1026_s1 + $0x38] sm:$0xff]  ;;  %v53_v11 = vld [vmem:[%s1026_s1 + $0x30] sm:$0xff]  ;;  %v52_v12 = vld [vmem:[%s1026_s1 + $0x28] sm:$0xff] }
  0x13   :  { %594 = vmatpush3.xpose.msk.msra.mxu0 %vm70_vm0, %v58_v6  ;;  %685 = vmatpush3.xpose.msk.msra.mxu1 %vm70_vm0, %v58_v6  ;;  %v51_v13 = vld [vmem:[%s1026_s1 + $0x20] sm:$0xff]  ;;  %v50_v14 = vld [vmem:[%s1026_s1 + $0x18] sm:$0xff]  ;;  %v49_v15 = vld [vmem:[%s1026_s1 + $0x10] sm:$0xff] }
  0x14   :  { %595 = vmatprep.subr.msk.mxu0 %vm70_vm0, %v57_v7  ;;  %670 = vmatprep.subr.msk.mxu1 %vm70_vm0, %v57_v7  ;;  %v48_v16 = vld [vmem:[%s1026_s1 + $0x8] sm:$0xff]  ;;  %v47_v17 = vld [vmem:[%s1026_s1] sm:$0xff]  ;;  %v17_v20 = vld [vmem:[%s1025_s0 + $0x10] sm:$0xff] }
  0x15   :  { %v16_v18 = vld [vmem:[%s1025_s0 + $0x8] sm:$0xff]  ;;  %v33_v21 = vld [vmem:[%s1025_s0 + $0x90] sm:$0xff]  ;;  %v18_v22 = vld [vmem:[%s1025_s0 + $0x18] sm:$0xff] }
  0x16   :  { %v32_v19 = vld [vmem:[%s1025_s0 + $0x88] sm:$0xff]  ;;  %v34_v23 = vld [vmem:[%s1025_s0 + $0x98] sm:$0xff]  ;;  %v19_v24 = vld [vmem:[%s1025_s0 + $0x20] sm:$0xff] }
  0x17   :  { %596 = vmatpush3.xpose.msk.msra.mxu0 %vm70_vm0, %v57_v7  ;;  %686 = vmatpush3.xpose.msk.msra.mxu1 %vm70_vm0, %v57_v7  ;;  %v35_v25 = vld [vmem:[%s1025_s0 + $0xa0] sm:$0xff]  ;;  %v20_v26 = vld [vmem:[%s1025_s0 + $0x28] sm:$0xff]  ;;  %v21_v28 = vld [vmem:[%s1025_s0 + $0x30] sm:$0xff] }
  0x18   :  { %597 = vmatprep.subr.msk.mxu0 %vm70_vm0, %v56_v8  ;;  %671 = vmatprep.subr.msk.mxu1 %vm70_vm0, %v56_v8  ;;  %v36_v27 = vld [vmem:[%s1025_s0 + $0xa8] sm:$0xff]  ;;  %v37_v29 = vld [vmem:[%s1025_s0 + $0xb0] sm:$0xff]  ;;  %v22_v30 = vld [vmem:[%s1025_s0 + $0x38] sm:$0xff] }
  0x19   :  { %v38_v31 = vld [vmem:[%s1025_s0 + $0xb8] sm:$0xff]  ;;  %v23_v32 = vld [vmem:[%s1025_s0 + $0x40] sm:$0xff]  ;;  %v24_v34 = vld [vmem:[%s1025_s0 + $0x48] sm:$0xff] }
  0x1a   :  { %v39_v33 = vld [vmem:[%s1025_s0 + $0xc0] sm:$0xff]  ;;  %v40_v35 = vld [vmem:[%s1025_s0 + $0xc8] sm:$0xff]  ;;  %v25_v36 = vld [vmem:[%s1025_s0 + $0x50] sm:$0xff] }
  0x1b   :  { %598 = vmatpush3.xpose.msk.msra.mxu0 %vm70_vm0, %v56_v8  ;;  %687 = vmatpush3.xpose.msk.msra.mxu1 %vm70_vm0, %v56_v8  ;;  %v41_v37 = vld [vmem:[%s1025_s0 + $0xd0] sm:$0xff]  ;;  %v26_v38 = vld [vmem:[%s1025_s0 + $0x58] sm:$0xff]  ;;  %v27_v40 = vld [vmem:[%s1025_s0 + $0x60] sm:$0xff] }
  0x1c   :  { %599 = vmatprep.subr.msk.mxu0 %vm70_vm0, %v55_v9  ;;  %672 = vmatprep.subr.msk.mxu1 %vm70_vm0, %v55_v9  ;;  %v42_v39 = vld [vmem:[%s1025_s0 + $0xd8] sm:$0xff]  ;;  %v43_v41 = vld [vmem:[%s1025_s0 + $0xe0] sm:$0xff]  ;;  %v28_v42 = vld [vmem:[%s1025_s0 + $0x68] sm:$0xff] }
  0x1d   :  { %v44_v43 = vld [vmem:[%s1025_s0 + $0xe8] sm:$0xff]  ;;  %v29_v44 = vld [vmem:[%s1025_s0 + $0x70] sm:$0xff]  ;;  %v30_v46 = vld [vmem:[%s1025_s0 + $0x78] sm:$0xff] }
  0x1e   :  { %v45_v45 = vld [vmem:[%s1025_s0 + $0xf0] sm:$0xff]  ;;  %v46_v47 = vld [vmem:[%s1025_s0 + $0xf8] sm:$0xff]  ;;  %v988_v48 = vld [vmem:[%s1027_s2] ss:$0 sm:$0xff]  ;;  %s722_s0 = smov [#allocation2]  }
  0x1f   :  { %600 = vmatpush3.xpose.msk.msra.mxu0 %vm70_vm0, %v55_v9  ;;  %688 = vmatpush3.xpose.msk.msra.mxu1 %vm70_vm0, %v55_v9  ;;  %s477_s2 = sshll.u32 %s722_s0, 4  ;;  %s478_s2 = int_to_ptr.vmem [resolvable:$true] %s477_s2 }
  0x20   :  { %601 = vmatprep.subr.msk.mxu0 %vm70_vm0, %v54_v10  ;;  %673 = vmatprep.subr.msk.mxu1 %vm70_vm0, %v54_v10  ;;  %s700_s26 = scalar_lea.vmem %s478_s2, 4096  ;;  %p705_p1 = scmp.lt.s32.totalorder %s478_s2, %s478_s2 }
  0x21   :  { %p701_p0 = scmp.ne.s32.totalorder %s478_s2, %s700_s26  ;;  %p706_p2 = scmp.lt.s32.totalorder %s700_s26, %s700_s26 }
  0x23   :  { %602 = vmatpush3.xpose.msk.msra.mxu0 %vm70_vm0, %v54_v10  ;;  %689 = vmatpush3.xpose.msk.msra.mxu1 %vm70_vm0, %v54_v10  ;;  %p707_p3 = por %p706_p2, %p705_p1 }
  0x24   :  { %603 = vmatprep.subr.msk.mxu0 %vm70_vm0, %v53_v11  ;;  %674 = vmatprep.subr.msk.mxu1 %vm70_vm0, %v53_v11 }
  0x25   :  { %p708_p4 = pnand %p707_p3, %p701_p0 }
  0x27   :  { %604 = vmatpush3.xpose.msk.msra.mxu0 %vm70_vm0, %v53_v11  ;;  %690 = vmatpush3.xpose.msk.msra.mxu1 %vm70_vm0, %v53_v11 }
  0x28   :  { %605 = vmatprep.subr.msk.mxu0 %vm70_vm0, %v52_v12  ;;  %675 = vmatprep.subr.msk.mxu1 %vm70_vm0, %v52_v12 }
  0x2b   :  { %606 = vmatpush3.xpose.msk.msra.mxu0 %vm70_vm0, %v52_v12  ;;  %691 = vmatpush3.xpose.msk.msra.mxu1 %vm70_vm0, %v52_v12 }
  0x2c   :  { %607 = vmatprep.subr.msk.mxu0 %vm70_vm0, %v51_v13  ;;  %676 = vmatprep.subr.msk.mxu1 %vm70_vm0, %v51_v13 }
  0x2f   :  { %608 = vmatpush3.xpose.msk.msra.mxu0 %vm70_vm0, %v51_v13  ;;  %692 = vmatpush3.xpose.msk.msra.mxu1 %vm70_vm0, %v51_v13 }
  0x30   :  { %609 = vmatprep.subr.msk.mxu0 %vm70_vm0, %v50_v14  ;;  %677 = vmatprep.subr.msk.mxu1 %vm70_vm0, %v50_v14 }
  0x33   :  { %610 = vmatpush3.xpose.msk.msra.mxu0 %vm70_vm0, %v50_v14  ;;  %693 = vmatpush3.xpose.msk.msra.mxu1 %vm70_vm0, %v50_v14 }
  0x34   :  { %611 = vmatprep.subr.msk.mxu0 %vm70_vm0, %v49_v15  ;;  %678 = vmatprep.subr.msk.mxu1 %vm70_vm0, %v49_v15 }
  0x37   :  { %612 = vmatpush3.xpose.msk.msra.mxu0 %vm70_vm0, %v49_v15  ;;  %694 = vmatpush3.xpose.msk.msra.mxu1 %vm70_vm0, %v49_v15 }
  0x38   :  { %613 = vmatprep.subr.msk.mxu0 %vm70_vm0, %v48_v16  ;;  %679 = vmatprep.subr.msk.mxu1 %vm70_vm0, %v48_v16 }
  0x3b   :  { %614 = vmatpush3.xpose.msk.msra.mxu0 %vm70_vm0, %v48_v16  ;;  %695 = vmatpush3.xpose.msk.msra.mxu1 %vm70_vm0, %v48_v16 }
  0x3c   :  { %615 = vmatprep.subr.msk.mxu0 %vm70_vm0, %v47_v17  ;;  %680 = vmatprep.subr.msk.mxu1 %vm70_vm0, %v47_v17 }
  0x3f   :  { %616 = vmatpush3.xpose.msk.msra.mxu0 %vm70_vm0, %v47_v17  ;;  %696 = vmatpush3.xpose.msk.msra.mxu1 %vm70_vm0, %v47_v17 }
  0x42   :  { %618 = vmatmul.mubr.msk.f32.vlgmr.msra.gmra.mxu0 %vm70_vm0, %v16_v18  ;;  %642 = vmatmul.mubr.msk.f32.vlgmr.msra.gmra.mxu1 %vm70_vm0, %v32_v19 }
  0x43   :  { %620 = vmatprep.mubr.msk.f32.mxu0 %vm70_vm0, %v17_v20  ;;  %644 = vmatprep.mubr.msk.f32.mxu1 %vm70_vm0, %v33_v21 }
  0x46   :  { %621 = vmatmul.mubr.msk.f32.gmra.mxu0 %vm70_vm0, %v18_v22  ;;  %645 = vmatmul.mubr.msk.f32.gmra.mxu1 %vm70_vm0, %v34_v23 }
  0x47   :  { %623 = vmatprep.mubr.msk.f32.mxu0 %vm70_vm0, %v19_v24  ;;  %647 = vmatprep.mubr.msk.f32.mxu1 %vm70_vm0, %v35_v25 }
  0x4a   :  { %624 = vmatmul.mubr.msk.f32.gmra.mxu0 %vm70_vm0, %v20_v26  ;;  %648 = vmatmul.mubr.msk.f32.gmra.mxu1 %vm70_vm0, %v36_v27 }
  0x4b   :  { %626 = vmatprep.mubr.msk.f32.mxu0 %vm70_vm0, %v21_v28  ;;  %650 = vmatprep.mubr.msk.f32.mxu1 %vm70_vm0, %v37_v29 }
  0x4e   :  { %627 = vmatmul.mubr.msk.f32.gmra.mxu0 %vm70_vm0, %v22_v30  ;;  %651 = vmatmul.mubr.msk.f32.gmra.mxu1 %vm70_vm0, %v38_v31 }
  0x4f   :  { %629 = vmatprep.mubr.msk.f32.mxu0 %vm70_vm0, %v23_v32  ;;  %653 = vmatprep.mubr.msk.f32.mxu1 %vm70_vm0, %v39_v33 }
  0x52   :  { %630 = vmatmul.mubr.msk.f32.gmra.mxu0 %vm70_vm0, %v24_v34  ;;  %654 = vmatmul.mubr.msk.f32.gmra.mxu1 %vm70_vm0, %v40_v35 }
  0x53   :  { %632 = vmatprep.mubr.msk.f32.mxu0 %vm70_vm0, %v25_v36  ;;  %656 = vmatprep.mubr.msk.f32.mxu1 %vm70_vm0, %v41_v37 }
  0x56   :  { %633 = vmatmul.mubr.msk.f32.gmra.mxu0 %vm70_vm0, %v26_v38  ;;  %657 = vmatmul.mubr.msk.f32.gmra.mxu1 %vm70_vm0, %v42_v39 }
  0x57   :  { %635 = vmatprep.mubr.msk.f32.mxu0 %vm70_vm0, %v27_v40  ;;  %659 = vmatprep.mubr.msk.f32.mxu1 %vm70_vm0, %v43_v41 }
  0x5a   :  { %636 = vmatmul.mubr.msk.f32.gmra.mxu0 %vm70_vm0, %v28_v42  ;;  %660 = vmatmul.mubr.msk.f32.gmra.mxu1 %vm70_vm0, %v44_v43 }
  0x5b   :  { %638 = vmatprep.mubr.msk.f32.mxu0 %vm70_vm0, %v29_v44  ;;  %662 = vmatprep.mubr.msk.f32.mxu1 %vm70_vm0, %v45_v45 }
  0x5e   :  { %639 = vmatmul.mubr.msk.f32.gmra.mxu0 %vm70_vm0, %v30_v46  ;;  %663 = vmatmul.mubr.msk.f32.gmra.mxu1 %vm70_vm0, %v46_v47 }
 0x102   :  { %v619_v49 = vpop.f32.mrf.mxu0  ;;  %v643_v50 = vpop.f32.mrf.mxu1 }
 0x103   :  { %v287_v51 = vadd.f32 %v619_v49, %v988_v48  ;;  %v367_v52 = vadd.f32 %v643_v50, %v988_v48 }
 0x104   :  { %v281_v53 = vpop.f32.mrf.mxu0  ;;  %v361_v54 = vpop.f32.mrf.mxu1 }
 0x105   :  { %441 = vst [vmem:[#allocation2 + $0x8] sm:$0xff] %v287_v51  ;;  %457 = vst [vmem:[#allocation2 + $0x88] sm:$0xff] %v367_v52  ;;  %v282_v55 = vadd.f32 %v988_v48, %v281_v53  ;;  %v362_v56 = vadd.f32 %v988_v48, %v361_v54 }
 0x106   :  { %v622_v57 = vpop.f32.mrf.mxu0  ;;  %v646_v58 = vpop.f32.mrf.mxu1 }
 0x107   :  { %440 = vst [vmem:[#allocation2] sm:$0xff] %v282_v55  ;;  %456 = vst [vmem:[#allocation2 + $0x80] sm:$0xff] %v362_v56  ;;  %v297_v59 = vadd.f32 %v622_v57, %v988_v48  ;;  %v377_v60 = vadd.f32 %v646_v58, %v988_v48 }
 0x108   :  { %v291_v61 = vpop.f32.mrf.mxu0  ;;  %v371_v62 = vpop.f32.mrf.mxu1 }
 0x109   :  { %443 = vst [vmem:[#allocation2 + $0x18] sm:$0xff] %v297_v59  ;;  %459 = vst [vmem:[#allocation2 + $0x98] sm:$0xff] %v377_v60  ;;  %v292_v63 = vadd.f32 %v988_v48, %v291_v61  ;;  %v372_v0 = vadd.f32 %v988_v48, %v371_v62 }
 0x10a   :  { %v625_v1 = vpop.f32.mrf.mxu0  ;;  %v649_v2 = vpop.f32.mrf.mxu1 }
 0x10b   :  { %442 = vst [vmem:[#allocation2 + $0x10] sm:$0xff] %v292_v63  ;;  %458 = vst [vmem:[#allocation2 + $0x90] sm:$0xff] %v372_v0  ;;  %v307_v3 = vadd.f32 %v625_v1, %v988_v48  ;;  %v387_v4 = vadd.f32 %v649_v2, %v988_v48 }
 0x10c   :  { %v301_v5 = vpop.f32.mrf.mxu0  ;;  %v381_v6 = vpop.f32.mrf.mxu1 }
 0x10d   :  { %445 = vst [vmem:[#allocation2 + $0x28] sm:$0xff] %v307_v3  ;;  %461 = vst [vmem:[#allocation2 + $0xa8] sm:$0xff] %v387_v4  ;;  %v302_v7 = vadd.f32 %v988_v48, %v301_v5  ;;  %v382_v8 = vadd.f32 %v988_v48, %v381_v6 }
 0x10e   :  { %v628_v9 = vpop.f32.mrf.mxu0  ;;  %v652_v10 = vpop.f32.mrf.mxu1 }
 0x10f   :  { %444 = vst [vmem:[#allocation2 + $0x20] sm:$0xff] %v302_v7  ;;  %460 = vst [vmem:[#allocation2 + $0xa0] sm:$0xff] %v382_v8  ;;  %v317_v11 = vadd.f32 %v628_v9, %v988_v48  ;;  %v397_v12 = vadd.f32 %v652_v10, %v988_v48 }
 0x110   :  { %v311_v13 = vpop.f32.mrf.mxu0  ;;  %v391_v14 = vpop.f32.mrf.mxu1 }
 0x111   :  { %447 = vst [vmem:[#allocation2 + $0x38] sm:$0xff] %v317_v11  ;;  %463 = vst [vmem:[#allocation2 + $0xb8] sm:$0xff] %v397_v12  ;;  %v312_v15 = vadd.f32 %v988_v48, %v311_v13  ;;  %v392_v16 = vadd.f32 %v988_v48, %v391_v14 }
 0x112   :  { %v631_v17 = vpop.f32.mrf.mxu0  ;;  %v655_v18 = vpop.f32.mrf.mxu1 }
 0x113   :  { %446 = vst [vmem:[#allocation2 + $0x30] sm:$0xff] %v312_v15  ;;  %462 = vst [vmem:[#allocation2 + $0xb0] sm:$0xff] %v392_v16  ;;  %v327_v19 = vadd.f32 %v631_v17, %v988_v48  ;;  %v407_v20 = vadd.f32 %v655_v18, %v988_v48 }
 0x114   :  { %v321_v21 = vpop.f32.mrf.mxu0  ;;  %v401_v22 = vpop.f32.mrf.mxu1 }
 0x115   :  { %449 = vst [vmem:[#allocation2 + $0x48] sm:$0xff] %v327_v19  ;;  %465 = vst [vmem:[#allocation2 + $0xc8] sm:$0xff] %v407_v20  ;;  %v322_v23 = vadd.f32 %v988_v48, %v321_v21  ;;  %v402_v24 = vadd.f32 %v988_v48, %v401_v22 }
 0x116   :  { %v634_v25 = vpop.f32.mrf.mxu0  ;;  %v658_v26 = vpop.f32.mrf.mxu1 }
 0x117   :  { %448 = vst [vmem:[#allocation2 + $0x40] sm:$0xff] %v322_v23  ;;  %464 = vst [vmem:[#allocation2 + $0xc0] sm:$0xff] %v402_v24  ;;  %v337_v27 = vadd.f32 %v634_v25, %v988_v48  ;;  %v417_v28 = vadd.f32 %v658_v26, %v988_v48 }
 0x118   :  { %v331_v29 = vpop.f32.mrf.mxu0  ;;  %v411_v30 = vpop.f32.mrf.mxu1 }
 0x119   :  { %451 = vst [vmem:[#allocation2 + $0x58] sm:$0xff] %v337_v27  ;;  %467 = vst [vmem:[#allocation2 + $0xd8] sm:$0xff] %v417_v28  ;;  %v332_v31 = vadd.f32 %v988_v48, %v331_v29  ;;  %v412_v32 = vadd.f32 %v988_v48, %v411_v30 }
 0x11a   :  { %v637_v33 = vpop.f32.mrf.mxu0  ;;  %v661_v34 = vpop.f32.mrf.mxu1 }
 0x11b   :  { %450 = vst [vmem:[#allocation2 + $0x50] sm:$0xff] %v332_v31  ;;  %466 = vst [vmem:[#allocation2 + $0xd0] sm:$0xff] %v412_v32  ;;  %v347_v35 = vadd.f32 %v637_v33, %v988_v48  ;;  %v427_v36 = vadd.f32 %v661_v34, %v988_v48 }
 0x11c   :  { %v341_v37 = vpop.f32.mrf.mxu0  ;;  %v421_v38 = vpop.f32.mrf.mxu1 }
 0x11d   :  { %453 = vst [vmem:[#allocation2 + $0x68] sm:$0xff] %v347_v35  ;;  %469 = vst [vmem:[#allocation2 + $0xe8] sm:$0xff] %v427_v36  ;;  %v342_v39 = vadd.f32 %v988_v48, %v341_v37  ;;  %v422_v40 = vadd.f32 %v988_v48, %v421_v38 }
 0x11e   :  { %v640_v41 = vpop.f32.mrf.mxu0  ;;  %v664_v42 = vpop.f32.mrf.mxu1 }
 0x11f   :  { %452 = vst [vmem:[#allocation2 + $0x60] sm:$0xff] %v342_v39  ;;  %468 = vst [vmem:[#allocation2 + $0xe0] sm:$0xff] %v422_v40  ;;  %v357_v43 = vadd.f32 %v640_v41, %v988_v48  ;;  %v437_v44 = vadd.f32 %v664_v42, %v988_v48 }
 0x120   :  { %v351_v45 = vpop.f32.mrf.mxu0  ;;  %v431_v46 = vpop.f32.mrf.mxu1 }
 0x121   :  { %455 = vst [vmem:[#allocation2 + $0x78] sm:$0xff] %v357_v43  ;;  %471 = vst [vmem:[#allocation2 + $0xf8] sm:$0xff] %v437_v44  ;;  %v352_v47 = vadd.f32 %v988_v48, %v351_v45  ;;  %v432_v49 = vadd.f32 %v988_v48, %v431_v46 }
 0x123   :  { %454 = vst [vmem:[#allocation2 + $0x70] sm:$0xff] %v352_v47  ;;  %470 = vst [vmem:[#allocation2 + $0xf0] sm:$0xff] %v432_v49 }
 0x124   :  { %711 = shalt.err (!%p708_p4)
}
 0x125   :  { %s723_s27 = smov 128   ;;  %s724_s28 = smov 8  }
 0x126   :  { %483 = dma.vmem_to_hbm [thread:$0]  %s478_s2, 4096, %s1028_s3, [#allocation3], %s723_s27, %s723_s27, %s724_s28  }
 0x127   :  { %720 = dma.done.wait [#allocation3], 4096  }
 0x128   :  { %721 = vsyncadd [#allocation3], 4294963200 }
 0x129   :  { %487 = vsyncpa [#allocation3], 1 }

</bundles_post_ra>
